<compile_context>
chip_gen: v5e
topology: v5e:2x2
jax: 0.10.0
libtpu: 0.0.40
codegen_flags: <defaults>
</compile_context>

<pallas_src>
import jax
import jax.numpy as jnp
from jax.experimental import pallas as pl
from jax.experimental.pallas import tpu as pltpu

N_NODES = 34                 # karate-club sized graph (GCNConv(34, 10) -> 34 input features)
F_IN, F_HID, F_OUT = 34, 10, 2
ROW_PAD = 48                 # next multiple of 16 (bf16 sublane tile) above 34 nodes
LANE_PAD = 128               # lane / feature dims padded to 128 for dense MXU tiles


def _gcn_net_kernel(ax_ref, a_ref, w_ref, b_ref, o_ref):
    """Fused 3-layer GCN forward for one graph's VMEM-resident tile.

    ax_ref: (ROW_PAD, LANE_PAD) bf16  -- precomputed A_hat @ x (layer-0 aggregation hoisted)
    a_ref : (ROW_PAD, ROW_PAD)  bf16  -- normalized adjacency
    w_ref : (3, LANE_PAD, LANE_PAD) bf16  -- padded weights (shared across grid steps)
    b_ref : (3, 1, LANE_PAD) f32          -- padded biases  (shared across grid steps)
    o_ref : (ROW_PAD, LANE_PAD) f32
    """
    a = a_ref[...]

    def dense(h_bf16, layer):
        # feature transform: bf16 x bf16 -> f32 accumulate on the MXU
        return jnp.dot(h_bf16, w_ref[layer], preferred_element_type=jnp.float32)

    def aggregate(xw_f32):
        # neighborhood aggregation on the MXU
        return jnp.dot(a, xw_f32.astype(jnp.bfloat16), preferred_element_type=jnp.float32)

    def relu_bf16(h_f32):
        # fused ReLU + downcast: next layer's matmul consumes bf16 directly
        return jnp.maximum(h_f32, 0.0).astype(jnp.bfloat16)

    # conv1 (34 -> 10): aggregation hoisted to preprocessing, so just AX @ W0 + b0.
    h = relu_bf16(dense(ax_ref[...], 0) + b_ref[0])
    # TODO(synk): nn.Dropout(0.5) implemented as identity (eval-mode semantics).
    # conv2 (10 -> 10) + ReLU
    h = relu_bf16(aggregate(dense(h, 1)) + b_ref[1])
    # conv3 (10 -> 2), no activation; single lane-dense f32 store
    o_ref[...] = aggregate(dense(h, 2)) + b_ref[2]


@jax.jit
def gcn_net_forward(ax_b, a_b, w_slab, b_slab):
    """Batched forward over G graphs.

    ax_b:   (G, ROW_PAD, LANE_PAD) bf16   a_b: (G, ROW_PAD, ROW_PAD) bf16
    w_slab: (3, LANE_PAD, LANE_PAD) bf16  b_slab: (3, 1, LANE_PAD) f32
    returns (G, N_NODES, F_OUT) f32
    """
    g = ax_b.shape[0]

    flops = g * (3 * 2 * ROW_PAD * LANE_PAD * LANE_PAD      # feature transforms
                 + 2 * 2 * ROW_PAD * ROW_PAD * LANE_PAD)     # two in-kernel aggregations
    bytes_accessed = (g * (ROW_PAD * LANE_PAD * 2            # AX bf16
                           + ROW_PAD * ROW_PAD * 2           # A_hat bf16
                           + ROW_PAD * LANE_PAD * 4)         # output f32
                      + 3 * LANE_PAD * LANE_PAD * 2          # weight slab bf16 (fetched once)
                      + 3 * LANE_PAD * 4)                    # bias slab f32

    out_p = pl.pallas_call(
        _gcn_net_kernel,
        out_shape=jax.ShapeDtypeStruct((g, ROW_PAD, LANE_PAD), jnp.float32),
        grid=(g,),
        in_specs=[
            pl.BlockSpec((None, ROW_PAD, LANE_PAD), lambda i: (i, 0, 0)),   # AX (per graph)
            pl.BlockSpec((None, ROW_PAD, ROW_PAD), lambda i: (i, 0, 0)),    # A_hat (per graph)
            pl.BlockSpec((3, LANE_PAD, LANE_PAD), lambda i: (0, 0, 0)),     # weights (shared)
            pl.BlockSpec((3, 1, LANE_PAD), lambda i: (0, 0, 0)),            # biases (shared)
        ],
        out_specs=pl.BlockSpec((None, ROW_PAD, LANE_PAD), lambda i: (i, 0, 0)),
        compiler_params=pltpu.CompilerParams(
            dimension_semantics=("parallel",)),
        cost_estimate=pl.CostEstimate(
            flops=flops, transcendentals=0, bytes_accessed=bytes_accessed),
    )(ax_b, a_b, w_slab, b_slab)
    return out_p[:, :N_NODES, :F_OUT]


def _pad2d(m, rows, cols, dtype):
    return jnp.pad(m, ((0, rows - m.shape[0]), (0, cols - m.shape[1]))).astype(dtype)


def preprocess_graph(x, edge_index, n):
    """Per-graph constants, built once (NOT per forward call):
       padded bf16 A_hat = D^-1/2 (A + I) D^-1/2  and  padded bf16 AX = A_hat @ x."""
    src, dst = edge_index[0], edge_index[1]
    # NOTE: scatter-set de-duplicates repeated edges (PyG would count duplicates).
    a = jnp.zeros((n, n), jnp.float32).at[dst, src].set(1.0)
    # add self-loops only where missing (matches add_remaining_self_loops, fill=1)
    a = jnp.maximum(a, jnp.eye(n, dtype=jnp.float32))
    deg = jnp.sum(a, axis=1)
    d_inv_sqrt = jnp.where(deg > 0, 1.0 / jnp.sqrt(deg), 0.0)
    a_hat = d_inv_sqrt[:, None] * a * d_inv_sqrt[None, :]
    ax = a_hat @ x                                # layer-0 aggregation hoisted out of the kernel
    a_p = _pad2d(a_hat, ROW_PAD, ROW_PAD, jnp.bfloat16)
    ax_p = _pad2d(ax, ROW_PAD, LANE_PAD, jnp.bfloat16)
    return a_p, ax_p


def init_params(key):
    """Pre-padded bf16 weight slab + f32 bias slab (padding hoisted out of forward)."""
    def glorot(k, fan_in, fan_out):
        bound = jnp.sqrt(6.0 / (fan_in + fan_out))
        w = jax.random.uniform(k, (fan_in, fan_out), jnp.float32, -bound, bound)
        return _pad2d(w, LANE_PAD, LANE_PAD, jnp.bfloat16)

    k1, k2, k3 = jax.random.split(key, 3)
    w_slab = jnp.stack([glorot(k1, F_IN, F_HID),
                        glorot(k2, F_HID, F_HID),
                        glorot(k3, F_HID, F_OUT)])            # (3, 128, 128) bf16
    b_slab = jnp.zeros((3, 1, LANE_PAD), jnp.float32)          # GCNConv biases init to zero
    return w_slab, b_slab


def _reference_forward(ax_p, a_p, w_slab, b_slab):
    """Pure-JAX reference with the same dtype pattern as the kernel (one graph)."""
    h = jnp.dot(ax_p, w_slab[0], preferred_element_type=jnp.float32) + b_slab[0]
    h = jnp.maximum(h, 0.0).astype(jnp.bfloat16)
    h = jnp.dot(a_p, jnp.dot(h, w_slab[1], preferred_element_type=jnp.float32
                             ).astype(jnp.bfloat16), preferred_element_type=jnp.float32)
    h = jnp.maximum(h + b_slab[1], 0.0).astype(jnp.bfloat16)
    h = jnp.dot(a_p, jnp.dot(h, w_slab[2], preferred_element_type=jnp.float32
                             ).astype(jnp.bfloat16), preferred_element_type=jnp.float32)
    return h + b_slab[2]


if __name__ == "__main__":
    key = jax.random.PRNGKey(0)
    k_params, k_graphs = jax.random.split(key)
    w_slab, b_slab = init_params(k_params)

    # Small batch of deterministic random graphs to exercise the parallel grid axis.
    N_GRAPHS = 4
    a_list, ax_list = [], []
    for gk in jax.random.split(k_graphs, N_GRAPHS):
        k_x, k_e = jax.random.split(gk)
        x = jax.random.normal(k_x, (N_NODES, F_IN), dtype=jnp.float32)
        pairs = jax.random.randint(k_e, (2, 78), 0, N_NODES, dtype=jnp.int32)
        edge_index = jnp.concatenate([pairs, jnp.stack([pairs[1], pairs[0]])], axis=1)
        a_p, ax_p = preprocess_graph(x, edge_index, N_NODES)   # hoisted per-graph preprocessing
        a_list.append(a_p)
        ax_list.append(ax_p)
    a_b = jnp.stack(a_list)      # (G, 48, 48)  bf16
    ax_b = jnp.stack(ax_list)    # (G, 48, 128) bf16

    out = gcn_net_forward(ax_b, a_b, w_slab, b_slab)
    out = jax.block_until_ready(out)

    assert out.shape == (N_GRAPHS, N_NODES, F_OUT), out.shape
    assert out.dtype == jnp.float32
    assert bool(jnp.all(jnp.isfinite(out)))

    # Correctness vs a pure-JAX reference using the same bf16/f32 pattern
    # (loose tolerance: bf16 operands on the MXU, accumulation order may differ).
    ref = jax.vmap(lambda ax, a: _reference_forward(ax, a, w_slab, b_slab))(ax_b, a_b)
    ref = ref[:, :N_NODES, :F_OUT]
    assert bool(jnp.allclose(out, ref, atol=5e-2, rtol=5e-2))

    print("KERNEL_OK")
</pallas_src>

<mosaic_0001>
module attributes {stable_mosaic.version = 11 : i64} {
  func.func @_gcn_net_kernel(%arg0: i32, %arg1: memref<1x48x128xbf16, #tpu.memory_space<vmem>>, %arg2: memref<1x48x48xbf16, #tpu.memory_space<vmem>>, %arg3: memref<3x128x128xbf16, #tpu.memory_space<vmem>>, %arg4: memref<3x1x128xf32, #tpu.memory_space<vmem>>, %arg5: memref<1x48x128xf32, #tpu.memory_space<vmem>>) attributes {dimension_semantics = [#tpu.dimension_semantics<parallel>], iteration_bounds = array<i64: 4>, scalar_prefetch = 0 : i64, scratch_operands = 0 : i64, tpu.core_type = #tpu.core_type<tc>, window_params = [{transform_indices = @transform_0, window_bounds = array<i64: 1, 48, 128>}, {transform_indices = @transform_1, window_bounds = array<i64: 1, 48, 48>}, {pipeline_mode = #tpu.pipeline_mode<synchronous>, transform_indices = @transform_2, window_bounds = array<i64: 3, 128, 128>}, {pipeline_mode = #tpu.pipeline_mode<synchronous>, transform_indices = @transform_3, window_bounds = array<i64: 3, 1, 128>}, {transform_indices = @transform_4, window_bounds = array<i64: 1, 48, 128>}]} {
    %c0 = arith.constant 0 : index
    %c0_0 = arith.constant 0 : index
    %c0_1 = arith.constant 0 : index
    %0 = vector.load %arg2[%c0, %c0_0, %c0_1] : memref<1x48x48xbf16, #tpu.memory_space<vmem>>, vector<1x48x48xbf16>
    %1 = vector.shape_cast %0 : vector<1x48x48xbf16> to vector<48x48xbf16>
    %c0_2 = arith.constant 0 : index
    %c0_3 = arith.constant 0 : index
    %c0_4 = arith.constant 0 : index
    %2 = vector.load %arg1[%c0_2, %c0_3, %c0_4] : memref<1x48x128xbf16, #tpu.memory_space<vmem>>, vector<1x48x128xbf16>
    %3 = vector.shape_cast %2 : vector<1x48x128xbf16> to vector<48x128xbf16>
    %c0_5 = arith.constant 0 : index
    %c0_6 = arith.constant 0 : index
    %c0_7 = arith.constant 0 : index
    %4 = vector.load %arg3[%c0_5, %c0_6, %c0_7] : memref<3x128x128xbf16, #tpu.memory_space<vmem>>, vector<1x128x128xbf16>
    %5 = vector.shape_cast %4 : vector<1x128x128xbf16> to vector<128x128xbf16>
    %cst = arith.constant dense<0.000000e+00> : vector<48x128xf32>
    %6 = tpu.matmul %3, %5, %cst {dimension_numbers = #tpu.dot_dimension_numbers<[1], [0], [0], [1], [0, 0, 1, 1], [], []>} : vector<48x128xbf16>, vector<128x128xbf16>, vector<48x128xf32> -> vector<48x128xf32>
    %c0_8 = arith.constant 0 : index
    %c0_9 = arith.constant 0 : index
    %c0_10 = arith.constant 0 : index
    %7 = vector.load %arg4[%c0_8, %c0_9, %c0_10] : memref<3x1x128xf32, #tpu.memory_space<vmem>>, vector<1x1x128xf32>
    %8 = vector.shape_cast %7 : vector<1x1x128xf32> to vector<1x128xf32>
    %9 = vector.broadcast %8 : vector<1x128xf32> to vector<48x128xf32>
    %10 = arith.addf %6, %9 : vector<48x128xf32>
    %cst_11 = arith.constant 0.000000e+00 : f32
    %11 = vector.broadcast %cst_11 : f32 to vector<48x128xf32>
    %12 = arith.maximumf %10, %11 : vector<48x128xf32>
    %13 = arith.truncf %12 : vector<48x128xf32> to vector<48x128xbf16>
    %c1 = arith.constant 1 : index
    %c0_12 = arith.constant 0 : index
    %c0_13 = arith.constant 0 : index
    %14 = vector.load %arg3[%c1, %c0_12, %c0_13] : memref<3x128x128xbf16, #tpu.memory_space<vmem>>, vector<1x128x128xbf16>
    %15 = vector.shape_cast %14 : vector<1x128x128xbf16> to vector<128x128xbf16>
    %cst_14 = arith.constant dense<0.000000e+00> : vector<48x128xf32>
    %16 = tpu.matmul %13, %15, %cst_14 {dimension_numbers = #tpu.dot_dimension_numbers<[1], [0], [0], [1], [0, 0, 1, 1], [], []>} : vector<48x128xbf16>, vector<128x128xbf16>, vector<48x128xf32> -> vector<48x128xf32>
    %17 = arith.truncf %16 : vector<48x128xf32> to vector<48x128xbf16>
    %cst_15 = arith.constant dense<0.000000e+00> : vector<48x128xf32>
    %18 = tpu.matmul %1, %17, %cst_15 {dimension_numbers = #tpu.dot_dimension_numbers<[1], [0], [0], [1], [0, 0, 1, 1], [], []>} : vector<48x48xbf16>, vector<48x128xbf16>, vector<48x128xf32> -> vector<48x128xf32>
    %c1_16 = arith.constant 1 : index
    %c0_17 = arith.constant 0 : index
    %c0_18 = arith.constant 0 : index
    %19 = vector.load %arg4[%c1_16, %c0_17, %c0_18] : memref<3x1x128xf32, #tpu.memory_space<vmem>>, vector<1x1x128xf32>
    %20 = vector.shape_cast %19 : vector<1x1x128xf32> to vector<1x128xf32>
    %21 = vector.broadcast %20 : vector<1x128xf32> to vector<48x128xf32>
    %22 = arith.addf %18, %21 : vector<48x128xf32>
    %cst_19 = arith.constant 0.000000e+00 : f32
    %23 = vector.broadcast %cst_19 : f32 to vector<48x128xf32>
    %24 = arith.maximumf %22, %23 : vector<48x128xf32>
    %25 = arith.truncf %24 : vector<48x128xf32> to vector<48x128xbf16>
    %c2 = arith.constant 2 : index
    %c0_20 = arith.constant 0 : index
    %c0_21 = arith.constant 0 : index
    %26 = vector.load %arg3[%c2, %c0_20, %c0_21] : memref<3x128x128xbf16, #tpu.memory_space<vmem>>, vector<1x128x128xbf16>
    %27 = vector.shape_cast %26 : vector<1x128x128xbf16> to vector<128x128xbf16>
    %cst_22 = arith.constant dense<0.000000e+00> : vector<48x128xf32>
    %28 = tpu.matmul %25, %27, %cst_22 {dimension_numbers = #tpu.dot_dimension_numbers<[1], [0], [0], [1], [0, 0, 1, 1], [], []>} : vector<48x128xbf16>, vector<128x128xbf16>, vector<48x128xf32> -> vector<48x128xf32>
    %29 = arith.truncf %28 : vector<48x128xf32> to vector<48x128xbf16>
    %cst_23 = arith.constant dense<0.000000e+00> : vector<48x128xf32>
    %30 = tpu.matmul %1, %29, %cst_23 {dimension_numbers = #tpu.dot_dimension_numbers<[1], [0], [0], [1], [0, 0, 1, 1], [], []>} : vector<48x48xbf16>, vector<48x128xbf16>, vector<48x128xf32> -> vector<48x128xf32>
    %c2_24 = arith.constant 2 : index
    %c0_25 = arith.constant 0 : index
    %c0_26 = arith.constant 0 : index
    %31 = vector.load %arg4[%c2_24, %c0_25, %c0_26] : memref<3x1x128xf32, #tpu.memory_space<vmem>>, vector<1x1x128xf32>
    %32 = vector.shape_cast %31 : vector<1x1x128xf32> to vector<1x128xf32>
    %33 = vector.broadcast %32 : vector<1x128xf32> to vector<48x128xf32>
    %34 = arith.addf %30, %33 : vector<48x128xf32>
    %c0_27 = arith.constant 0 : index
    %c0_28 = arith.constant 0 : index
    %c0_29 = arith.constant 0 : index
    %35 = vector.load %arg5[%c0_27, %c0_28, %c0_29] : memref<1x48x128xf32, #tpu.memory_space<vmem>>, vector<1x48x128xf32>
    %36 = vector.shape_cast %35 : vector<1x48x128xf32> to vector<48x128xf32>
    %37 = vector.shape_cast %34 : vector<48x128xf32> to vector<1x48x128xf32>
    tpu.vector_store %arg5[%c0_27, %c0_28, %c0_29], %37 {strides = array<i32>} : memref<1x48x128xf32, #tpu.memory_space<vmem>>, vector<1x48x128xf32>,
    return
  }
  func.func @transform_0(%arg0: i32) -> (i32, i32, i32) {
    %c0_i32 = arith.constant 0 : i32
    %c0_i32_0 = arith.constant 0 : i32
    %c0_i32_1 = arith.constant 0 : i32
    return %arg0, %c0_i32, %c0_i32_0 : i32, i32, i32
  }
  func.func @transform_1(%arg0: i32) -> (i32, i32, i32) {
    %c0_i32 = arith.constant 0 : i32
    %c0_i32_0 = arith.constant 0 : i32
    %c0_i32_1 = arith.constant 0 : i32
    return %arg0, %c0_i32, %c0_i32_0 : i32, i32, i32
  }
  func.func @transform_2(%arg0: i32) -> (i32, i32, i32) {
    %c0_i32 = arith.constant 0 : i32
    %c0_i32_0 = arith.constant 0 : i32
    %c0_i32_1 = arith.constant 0 : i32
    %c0_i32_2 = arith.constant 0 : i32
    return %c0_i32, %c0_i32_0, %c0_i32_1 : i32, i32, i32
  }
  func.func @transform_3(%arg0: i32) -> (i32, i32, i32) {
    %c0_i32 = arith.constant 0 : i32
    %c0_i32_0 = arith.constant 0 : i32
    %c0_i32_1 = arith.constant 0 : i32
    %c0_i32_2 = arith.constant 0 : i32
    return %c0_i32, %c0_i32_0, %c0_i32_1 : i32, i32, i32
  }
  func.func @transform_4(%arg0: i32) -> (i32, i32, i32) {
    %c0_i32 = arith.constant 0 : i32
    %c0_i32_0 = arith.constant 0 : i32
    %c0_i32_1 = arith.constant 0 : i32
    return %arg0, %c0_i32, %c0_i32_0 : i32, i32, i32
  }
}

</mosaic_0001>

<bundles_post_ra>
// kernel: gcn_net_forward.1
= control target key start
LH: loop header
LB: loop body
LE: loop exit
PB: predicated region body
PF: predicated region fallthrough
CT: control target
= control target key end

     0   :  { %9 = vsyncpa [#allocation3], 0  ;;  %s1425_s0 = inlined_call_operand.hbm [shape: bf16[4,48,128], index: 0, kind: input, shape index: {}]   ;;  %s1426_s1 = inlined_call_operand.hbm [shape: bf16[4,48,48], index: 1, kind: input, shape index: {}]   ;;  %s1427_s2 = inlined_call_operand.hbm [shape: bf16[3,128,128], index: 2, kind: input, shape index: {}]   ;;  %s1428_s3 = inlined_call_operand.hbm [shape: f32[3,1,128], index: 3, kind: input, shape index: {}]   ;;  %s1429_s4 = inlined_call_operand.vmem [shape: f32[4,48,128], index: 4, kind: output, shape index: {}]  }
   0x1   :  { %11 = vsyncpa [#allocation3 + $0x1], 0 }
   0x2   :  { %12 = vsyncpa [#allocation5], 0 }
   0x3   :  { %14 = vsyncpa [#allocation5 + $0x1], 0 }
   0x4   :  { %15 = vsyncpa [#allocation8], 0  ;;  %s1267_s15 = smov 0   ;;  %s1269_s16 = smov 0  }
   0x5   :  { %s1271_s17 = smov 0   ;;  %s1273_s18 = smov 0  }
   0x6 LB: > { %s1286_s19 = sadd.s32 4294967295, %s1234_s18   ;;  %p41_p0 = scmp.ne.s32.totalorder %s1226_s16, %s1222_s15  ;;  %s1234_s18 = sphi %s1273_s18, %s1436_s18   ;;  %s1230_s17 = sphi %s1271_s17, %s1435_s17   ;;  %s1226_s16 = sphi %s1269_s16, %s1434_s16   ;;  %s1222_s15 = sphi %s1267_s15, %s1433_s15  }
   0x7   : > { %p42_p1 = scmp.eq.s32.totalorder %s1286_s19, 0  ;;  %p819_p2 = scmp.ge.s32.totalorder %s1234_s18, 1 }
   0x8   : > { %p146_p3 = scmp.lt.s32.totalorder %s1234_s18, 5  ;;  %s157_s23 = sshll.u32 %s1427_s2, 4  ;;  %s158_s23 = int_to_ptr.hbm [resolvable:$true] %s157_s23 }
   0x9   : > { %p1294_p4 = por %p42_p1, %p41_p0  ;;  %s1236_s25 = smov [#allocation6]  }
   0xa   : > { %p1301_p5 = pnand %p819_p2, %p146_p3  ;;  %s159_s26 = sshll.u32 %s1236_s25, 4  ;;  %s160_s26 = int_to_ptr.vmem [resolvable:$true] %s159_s26 }
   0xb   : > { %s171_s29 = sshll.u32 %s1428_s3, 4  ;;  %s1237_s30 = smov 64   ;;  %s172_s29 = int_to_ptr.hbm [resolvable:$true] %s171_s29 }
   0xc   : > { %p1008_p6 = pneg %p1301_p5  ;;  %s1238_s5 = smov 4  }
   0xd   : > { %s1239_s6 = smov [#allocation7]   ;;  %s1240_s8 = smov 16  }
   0xe   : > { %p1009_p7 = pnand %p1008_p6, %p42_p1  ;;  %s173_s7 = sshll.u32 %s1239_s6, 4  ;;  %s174_s7 = int_to_ptr.vmem [resolvable:$true] %s173_s7 }
   0xf   : > { %s1241_s9 = smov 1   ;;  %s1316_s10 = sadd.s32 1, %s1234_s18  }
  0x10   : > { %1011 = dma.hbm_to_vmem [thread:$0]  (!%p1009_p7), %s158_s23, 3072, %s160_s26, [#allocation5], %s1237_s30, %s1237_s30, %s1238_s5  }
  0x11   : > { %1014 = dma.hbm_to_vmem [thread:$0]  (!%p1009_p7), %s172_s29, 48, %s174_s7, [#allocation8], %s1240_s8, %s1240_s8, %s1241_s9  }
  0x12   : > { %s25_s11 = ssub.s32 %s1234_s18, %s1316_s10  ;;  %s28_s12 = sadd.s32 1, %s1230_s17 }
  0x13   : > { %p26_p8 = scmp.eq.s32.totalorder %s25_s11, 0  ;;  %p35_p9 = scmp.ne.s32.totalorder %s1230_s17, %s1226_s16 }
  0x14   : > { %p36_p10 = scmp.eq.s32.totalorder %s1234_s18, 0  ;;  %p1024_p12 = scmp.lt.s32.totalorder %s1234_s18, 4 }
  0x15   : > { %s1325_s13 = scalar_select %p26_p8, %s1230_s17, %s28_s12  }
  0x16   : > { %p37_p11 = por %p36_p10, %p35_p9  ;;  %s187_s14 = sand.u32 1, %s1230_s17  }
  0x17   : > { %s991_s15 = smul.u32 24, %s1234_s18  ;;  %s188_s6 = scalar_lea.sflag [#allocation3], %s187_s14 }
  0x18   : > { %s990_s21 = smul.u32 24, %s187_s14  ;;  %p1333_p13 = pnand %p1024_p12, %p37_p11 }
  0x19   : > { %s196_s25 = scalar_lea.hbm %s1425_s0, %s991_s15  ;;  %s1135_s12 = scalar_lea.hbm %s1425_s0, 96 }
  0x1a   : > { %s197_s27 = sshll.u32 %s196_s25, 4  ;;  %s191_s28 = scalar_lea.vmem [#allocation2], %s990_s21  ;;  %s198_s27 = int_to_ptr.hbm [resolvable:$true] %s197_s27 }
  0x1b   : > { %s199_s29 = sshll.u32 %s191_s28, 4  ;;  %s1128_s7 = sshra.s32 %s198_s27, 4  ;;  %s200_s29 = int_to_ptr.vmem [resolvable:$true] %s199_s29  ;;  %s1129_s7 = int_to_ptr.hbm [resolvable:$true] %s1128_s7 }
  0x1c   : > { %s1130_s8 = scalar_lea.hbm %s1129_s7, 24  ;;  %p1132_p2 = pneg %p1333_p13 }
  0x1d   : > { %p1131_p0 = scmp.ne.s32.totalorder %s1129_s7, %s1130_s8  ;;  %p1136_p7 = scmp.lt.s32.totalorder %s1129_s7, %s1425_s0 }
  0x1e   : > { %p1137_p8 = scmp.lt.s32.totalorder %s1135_s12, %s1130_s8 }
  0x1f   : > { %p1133_p3 = pnand %p1132_p2, %p1131_p0 }
  0x20   : > { %p1138_p9 = por %p1137_p8, %p1136_p7 }
  0x21   : > { %p1134_p6 = pneg %p1133_p3 }
  0x23   : > { %p1139_p10 = pnand %p1138_p9, %p1134_p6 }
  0x25   : > { %1142 = shalt.err (!%p1139_p10)
}
  0x26   : > { %1018 = dma.hbm_to_vmem [thread:$0]  (!%p1333_p13), %s198_s27, 384, %s200_s29, %s188_s6, %s1237_s30, %s1237_s30, %s1238_s5  }
  0x27   : > { %s209_s14 = sand.u32 1, %s1234_s18   ;;  %s218_s9 = scalar_lea.hbm %s1426_s1, %s991_s15 }
  0x28   : > { %s219_s11 = sshll.u32 %s218_s9, 4  ;;  %s213_s22 = scalar_lea.vmem [#allocation4], %s990_s21  ;;  %s220_s11 = int_to_ptr.hbm [resolvable:$true] %s219_s11 }
  0x29   : > { %s221_s7 = sshll.u32 %s213_s22, 4  ;;  %s210_s8 = scalar_lea.sflag [#allocation5], %s209_s14  ;;  %s222_s7 = int_to_ptr.vmem [resolvable:$true] %s221_s7 }
  0x2a   : > { %s1158_s12 = sshra.s32 %s220_s11, 4  ;;  %s1165_s29 = scalar_lea.hbm %s1426_s1, 96  ;;  %s1159_s12 = int_to_ptr.hbm [resolvable:$true] %s1158_s12 }
  0x2b   : > { %s1160_s23 = scalar_lea.hbm %s1159_s12, 24  ;;  %p1166_p3 = scmp.lt.s32.totalorder %s1159_s12, %s1426_s1 }
  0x2c   : > { %p1161_p11 = scmp.ne.s32.totalorder %s1159_s12, %s1160_s23  ;;  %p1167_p6 = scmp.lt.s32.totalorder %s1165_s29, %s1160_s23 }
  0x2e   : > { %p1163_p12 = pnand %p1161_p11, %p1132_p2  ;;  %p1168_p7 = por %p1167_p6, %p1166_p3 }
  0x30   : > { %p1164_p0 = pneg %p1163_p12 }
  0x32   : > { %p1169_p8 = pnand %p1168_p7, %p1164_p0 }
  0x34   : > { %1172 = shalt.err (!%p1169_p8)
}
  0x35   : > { %1021 = dma.hbm_to_vmem [thread:$0]  (!%p1333_p13), %s220_s11, 384, %s222_s7, %s210_s8, %s1237_s30, %s1237_s30, %s1238_s5  }
  0x36   : > { %233 = sbr.rel (%p1301_p5) target bundleno = 918 (0x396), region = 36  ;;  %s235_s21 = sand.u32 (!%p1301_p5), 1, %s1226_s16  }
  0x37   : > { %s994_s14 = smul.u32 (!%p1301_p5), 24, %s235_s21  ;;  %s236_s25 = scalar_lea.sflag (!%p1301_p5), [#allocation3], %s235_s21 }
  0x39   : > { %s1374_s28 = scalar_lea.vmem (!%p1301_p5), [#allocation2], %s994_s14 }
  0x3b   : > { %1205 = dma.done.wait (%p1294_p4), %s236_s25, 384  }
  0x3c   : > { %1207 = vsyncadd (%p1294_p4), %s236_s25, 4294966912  ;;  %s245_s26 = sand.u32 1, %s1286_s19   ;;  %s1381_s30 = scalar_lea.vmem [#allocation4], %s994_s14 }
  0x3d   : > { %s246_s9 = scalar_lea.sflag [#allocation5], %s245_s26 }
  0x3e   : > { %1209 = dma.done.wait (%p1294_p4), %s246_s9, 384  }
  0x3f   : > { %1211 = vsyncadd (%p1294_p4), %s246_s9, 4294966912 }
  0x40   : > { %1213 = dma.done.wait (%p42_p1), [#allocation5], 3072  }
  0x41   : > { %1215 = vsyncadd (%p42_p1), [#allocation5], 4294964224 }
  0x42   : > { %1217 = dma.done.wait (%p42_p1), [#allocation8], 48  }
  0x43   : > { %1219 = vsyncadd (%p42_p1), [#allocation8], 4294967248  ;;  %v970_v0 = vld [vmem:[#allocation6 + $0x38] sm:$0xff]  ;;  %v969_v1 = vld [vmem:[#allocation6 + $0x30] sm:$0xff]  ;;  %vm539_vm0 = vcmask 392192   ;;  %p290_p1 = scmp.lt.s32.totalorder %s1286_s19, 3 }
  0x44   : > { %394 = vmatpush.bf16.msra.mxu0 %v970_v0  ;;  %v968_v2 = vld [vmem:[#allocation6 + $0x28] sm:$0xff]  ;;  %v967_v3 = vld [vmem:[#allocation6 + $0x20] sm:$0xff]  ;;  %v966_v4 = vld [vmem:[#allocation6 + $0x18] sm:$0xff] }
  0x45   : > { %v965_v5 = vld [vmem:[#allocation6 + $0x10] sm:$0xff]  ;;  %v964_v6 = vld [vmem:[#allocation6 + $0x8] sm:$0xff]  ;;  %v963_v7 = vld [vmem:[#allocation6] sm:$0xff]  ;;  %s1438_s19 = smov (!%p290_p1, %s1286_s19), 3 }
  0x46   : > { %v960_v8 = vld [vmem:[%s1374_s28] sm:$0xff]  ;;  %v977_v10 = vld [vmem:[#allocation6 + $0x70] sm:$0xff]  ;;  %v976_v11 = vld [vmem:[#allocation6 + $0x68] sm:$0xff]  ;;  %s995_s20 = smul.u32 48, %s1438_s19 }
  0x47   : > { %v978_v9 = vld [vmem:[#allocation6 + $0x78] sm:$0xff]  ;;  %v975_v12 = vld [vmem:[#allocation6 + $0x60] sm:$0xff]  ;;  %v962_v14 = vld [vmem:[%s1374_s28 + $0x10] sm:$0xff] }
  0x48   : > { %395 = vmatpush.bf16.msra.mxu0 %v969_v1  ;;  %492 = vmatpush.bf16.msra.mxu1 %v978_v9  ;;  %v961_v13 = vld [vmem:[%s1374_s28 + $0x8] sm:$0xff]  ;;  %v974_v15 = vld [vmem:[#allocation6 + $0x58] sm:$0xff]  ;;  %v973_v16 = vld [vmem:[#allocation6 + $0x50] sm:$0xff]  ;;  %s294_s11 = scalar_lea.vmem %s1429_s4, %s995_s20 }
  0x49   : > { %v972_v17 = vld [vmem:[#allocation6 + $0x48] sm:$0xff]  ;;  %v971_v18 = vld [vmem:[#allocation6 + $0x40] sm:$0xff]  ;;  %v986_v46 = vld [vmem:[#allocation6 + $0xb8] sm:$0xff] }
  0x4a   : > { %v1065_v20 = vld [vmem:[#allocation7] ss:$0 sm:$0xff]  ;;  %647 = vmatpush.bf16.msra.mxu3 %v986_v46  ;;  %v985_v48 = vld [vmem:[#allocation6 + $0xb0] sm:$0xff]  ;;  %v984_v50 = vld [vmem:[#allocation6 + $0xa8] sm:$0xff] }
  0x4b   : > { %v983_v52 = vld [vmem:[#allocation6 + $0xa0] sm:$0xff]  ;;  %v957_v54 = vld [vmem:[%s1381_s30] sm:$0xff]  ;;  %v958_v55 = vld [vmem:[%s1381_s30 + $0x8] sm:$0xff] }
  0x4c   : > { %396 = vmatpush.bf16.msra.mxu0 %v968_v2  ;;  %493 = vmatpush.bf16.msra.mxu1 %v977_v10  ;;  %v959_v56 = vld [vmem:[%s1381_s30 + $0x10] sm:$0xff]  ;;  %v981_v58 = vld [vmem:[#allocation6 + $0x90] sm:$0xff]  ;;  %v980_v59 = vld [vmem:[#allocation6 + $0x88] sm:$0xff] }
  0x4d   : > { %v982_v57 = vld [vmem:[#allocation6 + $0x98] sm:$0xff]  ;;  %v979_v60 = vld [vmem:[#allocation6 + $0x80] sm:$0xff] }
  0x4e   : > { %648 = vmatpush.bf16.msra.mxu3 %v985_v48  ;;  %v1066_v62 = vld [vmem:[#allocation7 + $0x1] ss:$0 sm:$0xff] }
  0x50   : > { %397 = vmatpush.bf16.msra.mxu0 %v967_v3  ;;  %494 = vmatpush.bf16.msra.mxu1 %v976_v11 }
  0x52   : > { %649 = vmatpush.bf16.msra.mxu3 %v984_v50 }
  0x54   : > { %398 = vmatpush.bf16.msra.mxu0 %v966_v4  ;;  %495 = vmatpush.bf16.msra.mxu1 %v975_v12 }
  0x56   : > { %650 = vmatpush.bf16.msra.mxu3 %v983_v52 }
  0x58   : > { %399 = vmatpush.bf16.msra.mxu0 %v965_v5  ;;  %496 = vmatpush.bf16.msra.mxu1 %v974_v15 }
  0x5a   : > { %651 = vmatpush.bf16.msra.mxu3 %v982_v57 }
  0x5c   : > { %400 = vmatpush.bf16.msra.mxu0 %v964_v6  ;;  %497 = vmatpush.bf16.msra.mxu1 %v973_v16 }
  0x5e   : > { %652 = vmatpush.bf16.msra.mxu3 %v981_v58 }
  0x60   : > { %401 = vmatpush.bf16.msra.mxu0 %v963_v7  ;;  %498 = vmatpush.bf16.msra.mxu1 %v972_v17 }
  0x62   : > { %653 = vmatpush.bf16.msra.mxu3 %v980_v59 }
  0x63   : > { %402 = vmatmul.bf16.vlgmr.msra.gmra.mxu0 %v960_v8 }
  0x64   : > { %499 = vmatpush.bf16.msra.mxu1 %v971_v18 }
  0x66   : > { %654 = vmatpush.bf16.msra.mxu3 %v979_v60 }
  0x73   : > { %407 = vmatmul.bf16.gmra.mxu0 %v961_v13 }
  0x83   : > { %412 = vmatmul.bf16.gmra.mxu0 %v962_v14 }
  0xe0   : > { %v403_v19 = vpop.f32.mrf.mxu0 }
  0xe1   : > { %v404_v21 = vadd.f32 %v1065_v20, %v403_v19 }
  0xe3   : > { %v418_v24 = vmax.f32 %v404_v21, 0.0 }
  0xe8   : > { %v405_v22 = vpop.f32.mrf.mxu0 }
  0xe9   : > { %v406_v23 = vadd.f32 %v1065_v20, %v405_v22 }
  0xeb   : > { %v419_v25 = vmax.f32 %v406_v23, 0.0 }
  0xed   : > { %v424_v26 = vpack.c.bf16 %v419_v25, %v418_v24 }
  0xef   : > { %500 = vmatmul.bf16.vlgmr.msra.gmra.mxu1 %v424_v26 }
  0xf0   : > { %v408_v27 = vpop.f32.mrf.mxu0 }
  0xf1   : > { %v409_v28 = vadd.f32 %v1065_v20, %v408_v27 }
  0xf3   : > { %v420_v31 = vmax.f32 %v409_v28, 0.0  ;;  %v1067_v28 = vld [vmem:[#allocation7 + $0x2] ss:$0 sm:$0xff] }
  0xf8   : > { %v410_v29 = vpop.f32.mrf.mxu0 }
  0xf9   : > { %v411_v30 = vadd.f32 %v1065_v20, %v410_v29 }
  0xfb   : > { %v421_v32 = vmax.f32 %v411_v30, 0.0 }
  0xfd   : > { %v425_v33 = vpack.c.bf16 %v421_v32, %v420_v31 }
  0xff   : > { %505 = vmatmul.bf16.gmra.mxu1 %v425_v33 }
 0x100   : > { %v413_v34 = vpop.f32.mrf.mxu0 }
 0x101   : > { %v414_v35 = vadd.f32 %v1065_v20, %v413_v34 }
 0x103   : > { %v422_v38 = vmax.f32 %v414_v35, 0.0 }
 0x108   : > { %v415_v36 = vpop.f32.mrf.mxu0 }
 0x109   : > { %v416_v37 = vadd.f32 %v1065_v20, %v415_v36 }
 0x10b   : > { %v423_v39 = vmax.f32 %v416_v37, 0.0 }
 0x10d   : > { %v426_v40 = vpack.c.bf16 %v423_v39, %v422_v38 }
 0x10f   : > { %510 = vmatmul.bf16.gmra.mxu1 %v426_v40 }
 0x16c   : > { %v501_v41 = vpop.f32.mrf.mxu1 }
 0x174   : > { %v503_v42 = vpop.f32.mrf.mxu1 }
 0x175   : > { %v516_v53 = vpack.c.bf16 %v503_v42, %v501_v41 }
 0x17c   : > { %v506_v43 = vpop.f32.mrf.mxu1 }
 0x184   : > { %v508_v44 = vpop.f32.mrf.mxu1 }
 0x185   : > { %v517_v51 = vpack.c.bf16 %v508_v44, %v506_v43 }
 0x18c   : > { %v511_v45 = vpop.f32.mrf.mxu1 }
 0x194   : > { %v513_v47 = vpop.f32.mrf.mxu1 }
 0x195   : > { %v518_v49 = vpack.c.bf16 %v513_v47, %v511_v45 }
 0x197   : > { %554 = vmatpush.bf16.msrb.mxu0 %v518_v49  ;;  %987 = vmatpush.bf16.msra.mxu2 %v518_v49 }
 0x19b   : > { %555 = vmatpush.bf16.msrb.mxu0 %v517_v51  ;;  %988 = vmatpush.bf16.msra.mxu2 %v517_v51 }
 0x19f   : > { %556 = vmatpush.bf16.msrb.mxu0 %v516_v53  ;;  %989 = vmatpush.bf16.msra.mxu2 %v516_v53 }
 0x1a2   : > { %917 = vmatmul.msk.bf16.vlgmr.msrb.gmra.mxu0 %vm539_vm0, %v957_v54  ;;  %918 = vmatmul.msk.bf16.vlgmr.msra.gmra.mxu2 %vm539_vm0, %v958_v55 }
 0x1b2   : > { %919 = vmatmul.msk.bf16.gmra.mxu2 %vm539_vm0, %v959_v56 }
 0x21f   : > { %v558_v61 = vpop.f32.mrf.mxu0 }
 0x220   : > { %v559_v0 = vadd.f32 %v1066_v62, %v558_v61 }
 0x222   : > { %v573_v3 = vmax.f32 %v559_v0, 0.0 }
 0x225   : > { %v563_v63 = vpop.f32.mrf.mxu2 }
 0x226   : > { %v564_v7 = vadd.f32 %v1066_v62, %v563_v63 }
 0x227   : > { %v560_v1 = vpop.f32.mrf.mxu0 }
 0x228   : > { %v561_v2 = vadd.f32 %v1066_v62, %v560_v1  ;;  %v575_v10 = vmax.f32 %v564_v7, 0.0 }
 0x22a   : > { %v574_v4 = vmax.f32 %v561_v2, 0.0 }
 0x22c   : > { %v579_v5 = vpack.c.bf16 %v574_v4, %v573_v3 }
 0x22d   : > { %v565_v6 = vpop.f32.mrf.mxu2 }
 0x22e   : > { %655 = vmatmul.bf16.vlgmr.msra.gmra.mxu3 %v579_v5  ;;  %v566_v8 = vadd.f32 %v1066_v62, %v565_v6 }
 0x230   : > { %v576_v11 = vmax.f32 %v566_v8, 0.0 }
 0x232   : > { %v580_v12 = vpack.c.bf16 %v576_v11, %v575_v10 }
 0x235   : > { %v568_v9 = vpop.f32.mrf.mxu2 }
 0x236   : > { %v569_v14 = vadd.f32 %v1066_v62, %v568_v9 }
 0x238   : > { %v577_v16 = vmax.f32 %v569_v14, 0.0 }
 0x23d   : > { %v570_v13 = vpop.f32.mrf.mxu2 }
 0x23e   : > { %660 = vmatmul.bf16.gmra.mxu3 %v580_v12  ;;  %v571_v15 = vadd.f32 %v1066_v62, %v570_v13 }
 0x240   : > { %v578_v17 = vmax.f32 %v571_v15, 0.0 }
 0x242   : > { %v581_v18 = vpack.c.bf16 %v578_v17, %v577_v16 }
 0x24e   : > { %665 = vmatmul.bf16.gmra.mxu3 %v581_v18 }
 0x2b1   : > { %v656_v19 = vpop.f32.mrf.mxu3 }
 0x2b9   : > { %v658_v20 = vpop.f32.mrf.mxu3 }
 0x2ba   : > { %v671_v27 = vpack.c.bf16 %v658_v20, %v656_v19 }
 0x2c1   : > { %v661_v21 = vpop.f32.mrf.mxu3 }
 0x2c9   : > { %v663_v22 = vpop.f32.mrf.mxu3 }
 0x2ca   : > { %v672_v26 = vpack.c.bf16 %v663_v22, %v661_v21 }
 0x2d1   : > { %v666_v23 = vpop.f32.mrf.mxu3 }
 0x2d9   : > { %v668_v24 = vpop.f32.mrf.mxu3 }
 0x2da   : > { %v673_v25 = vpack.c.bf16 %v668_v24, %v666_v23 }
 0x2dc   : > { %684 = vmatpush.bf16.msrb.mxu2 %v673_v25 }
 0x2e0   : > { %685 = vmatpush.bf16.msrb.mxu2 %v672_v26 }
 0x2e4   : > { %686 = vmatpush.bf16.msrb.mxu2 %v671_v27 }
 0x2e7   : > { %952 = vmatmul.msk.bf16.vlgmr.msrb.gmra.mxu2 %vm539_vm0, %v957_v54 }
 0x2f7   : > { %953 = vmatmul.msk.bf16.gmra.mxu2 %vm539_vm0, %v958_v55 }
 0x307   : > { %954 = vmatmul.msk.bf16.gmra.mxu2 %vm539_vm0, %v959_v56 }
 0x36a   : > { %v688_v29 = vpop.f32.mrf.mxu2 }
 0x36b   : > { %v689_v30 = vadd.f32 %v1067_v28, %v688_v29 }
 0x36d   : > { %703 = vst [vmem:[%s294_s11] sm:$0xff] %v689_v30 }
 0x372   : > { %v690_v31 = vpop.f32.mrf.mxu2 }
 0x373   : > { %v691_v32 = vadd.f32 %v1067_v28, %v690_v31 }
 0x375   : > { %704 = vst [vmem:[%s294_s11 + $0x8] sm:$0xff] %v691_v32 }
 0x37a   : > { %v693_v33 = vpop.f32.mrf.mxu2 }
 0x37b   : > { %v694_v34 = vadd.f32 %v1067_v28, %v693_v33 }
 0x37d   : > { %705 = vst [vmem:[%s294_s11 + $0x10] sm:$0xff] %v694_v34 }
 0x382   : > { %v695_v35 = vpop.f32.mrf.mxu2 }
 0x383   : > { %v696_v36 = vadd.f32 %v1067_v28, %v695_v35 }
 0x385   : > { %706 = vst [vmem:[%s294_s11 + $0x18] sm:$0xff] %v696_v36 }
 0x38a   : > { %v698_v37 = vpop.f32.mrf.mxu2 }
 0x38b   : > { %v699_v38 = vadd.f32 %v1067_v28, %v698_v37 }
 0x38d   : > { %707 = vst [vmem:[%s294_s11 + $0x20] sm:$0xff] %v699_v38 }
 0x392   : > { %v700_v39 = vpop.f32.mrf.mxu2 }
 0x393   : > { %v701_v40 = vadd.f32 %v1067_v28, %v700_v39 }
 0x395   : > { %708 = vst [vmem:[%s294_s11 + $0x28] sm:$0xff] %v701_v40 }
 0x396 PF: > { %p18_p4 = scmp.ge.s32.totalorder %s1316_s10, 6   ;;  %s1433_s15 = smov %s1226_s16 }
 0x397   : > { %s1434_s16 = smov %s1230_s17  ;;  %s1435_s17 = smov %s1325_s13 }
 0x398   : > { %s1436_s18 = smov %s1316_s10  ;;  %20 = sbr.rel (!%p18_p4) target bundleno = 6 (0x6), region = 101 }
 0x39d   :  { %730 = vsyncpa [#allocation3], 1 }
 0x39e   :  { %732 = vsyncpa [#allocation3 + $0x1], 1 }
 0x39f   :  { %733 = vsyncpa [#allocation5], 1 }
 0x3a0   :  { %735 = vsyncpa [#allocation5 + $0x1], 1 }
 0x3a1   :  { %736 = vsyncpa [#allocation8], 1 }

</bundles_post_ra>
